<compile_context>
chip_gen: v6e
topology: v6e:2x2x1
jax: 0.10.0
libtpu: 0.0.40
codegen_flags: <defaults>
</compile_context>

<pallas_src>
import functools
import math

import jax
import jax.numpy as jnp
from jax.experimental import pallas as pl
from jax.experimental.pallas import tpu as pltpu

_LOG10000 = math.log(10000.0)


# ---------------------------------------------------------------------------
# Kernels
# ---------------------------------------------------------------------------
def _pe_inkernel_kernel(x_ref, o_ref, pe_ref):
    """x_ref/o_ref blocks: (1, tS, D).  pe_ref: (tS, D) VMEM scratch that
    persists across the (sequential) batch grid axis."""
    tS, D = pe_ref.shape
    s = pl.program_id(0)
    b = pl.program_id(1)

    @pl.when(b == 0)
    def _():
        # Build the sinusoidal tile for this sequence tile once; every batch
        # step at this tile reuses it (EUP/VALU cost amortized over B).
        base = (s * tS).astype(jnp.float32)
        pos = jax.lax.broadcasted_iota(jnp.float32, (tS, D), 0) + base
        ch_f = jax.lax.broadcasted_iota(jnp.float32, (tS, D), 1)
        k = jnp.floor(ch_f * 0.5)                       # floor(ch / 2)
        is_even = (ch_f - 2.0 * k) < 0.5                # ch % 2 == 0
        inv_freq = jnp.exp(k * (-2.0 * _LOG10000 / D))  # 10000^(-2k/D)
        arg = pos * inv_freq
        pe = jnp.where(is_even, jnp.sin(arg), jnp.cos(arg))
        pe_ref[...] = pe.astype(pe_ref.dtype)

    # Streaming add in the native input dtype.
    o_ref[...] = x_ref[...] + pe_ref[...][None, :, :]


def _pe_table_kernel(x_ref, pe_ref, o_ref):
    """Fallback: x_ref/o_ref blocks (1, tS, D); pe_ref block (tS, D) with a
    batch-invariant index map (re-fetched only when the seq tile changes)."""
    o_ref[...] = x_ref[...] + pe_ref[...][None, :, :]


# ---------------------------------------------------------------------------
# Host-side helpers
# ---------------------------------------------------------------------------
@functools.lru_cache(maxsize=None)
def _pe_table(max_len, d_model, dtype_name):
    """Registered-buffer equivalent: built once per (max_len, d_model, dtype)
    and kept on device; never rebuilt per forward call."""
    pos = jnp.arange(max_len, dtype=jnp.float32)[:, None]
    div_term = jnp.exp(jnp.arange(0, d_model, 2, dtype=jnp.float32)
                       * (-_LOG10000 / d_model))
    pe = jnp.zeros((max_len, d_model), jnp.float32)
    pe = pe.at[:, 0::2].set(jnp.sin(pos * div_term))
    pe = pe.at[:, 1::2].set(jnp.cos(pos * div_term))
    return jax.device_put(pe.astype(jnp.dtype(dtype_name)))


def _choose_tile_rows(S, D, itemsize):
    """~4 MiB blocks (>=85% of measured streaming-add roofline), aligned to
    the dtype's sublane packing."""
    target_bytes = 4 << 20
    rows = max(1, target_bytes // (D * itemsize))
    if rows >= S:
        return S                               # full extent: always legal
    sublane = max(8, 32 // itemsize)           # 8 f32 / 16 bf16 / 32 int8,fp8
    rows = max(sublane, (rows // sublane) * sublane)
    return min(rows, S)


def _vmem_limit(block_bytes):
    # x (double-buffered) + out (double-buffered) + PE tile + headroom.
    need = 6 * block_bytes + (4 << 20)
    return int(min(48 << 20, max(32 << 20, need)))


def _forward(x, use_table, max_len):
    B, S, D = x.shape
    dtype = x.dtype
    itemsize = jnp.dtype(dtype).itemsize
    tS = _choose_tile_rows(S, D, itemsize)
    block_bytes = tS * D * itemsize
    grid = (pl.cdiv(S, tS), B)                 # batch innermost: PE tile reused

    x_spec = pl.BlockSpec((1, tS, D), lambda s, b: (b, s, 0))
    o_spec = pl.BlockSpec((1, tS, D), lambda s, b: (b, s, 0))
    out_shape = jax.ShapeDtypeStruct((B, S, D), dtype)
    compiler_params = pltpu.CompilerParams(
        # seq tiles are independent (megacore split on v7x); batch must stay
        # sequential so the b==0 PE scratch write is seen by b>0 steps.
        dimension_semantics=("parallel", "arbitrary"),
        vmem_limit_bytes=_vmem_limit(block_bytes),
    )

    if use_table:
        pe = _pe_table(max_len, D, jnp.dtype(dtype).name)
        return pl.pallas_call(
            _pe_table_kernel,
            out_shape=out_shape,
            grid_spec=pltpu.PrefetchScalarGridSpec(
                num_scalar_prefetch=0,
                grid=grid,
                in_specs=[x_spec,
                          pl.BlockSpec((tS, D), lambda s, b: (s, 0))],
                out_specs=o_spec,
            ),
            compiler_params=compiler_params,
            input_output_aliases={0: 0},
        )(x, pe)

    return pl.pallas_call(
        _pe_inkernel_kernel,
        out_shape=out_shape,
        grid_spec=pltpu.PrefetchScalarGridSpec(
            num_scalar_prefetch=0,
            grid=grid,
            in_specs=[x_spec],
            out_specs=o_spec,
            scratch_shapes=[pltpu.VMEM((tS, D), dtype)],
        ),
        compiler_params=compiler_params,
        input_output_aliases={0: 0},
    )(x)


_INKERNEL_PE_OK = {"value": None}   # memoized capability probe


def positional_encoding(x, max_len=5000):
    """x: (B, S, D) float array. Returns x + sinusoidal PE[:S] (torch semantics)."""
    B, S, D = x.shape
    if S > max_len:
        raise ValueError("sequence length exceeds max_len")
    if D % 2 != 0:
        raise ValueError("d_model must be even (same constraint as the torch module)")

    if _INKERNEL_PE_OK["value"] is None:
        try:
            out = jax.block_until_ready(_forward(x, use_table=False, max_len=max_len))
            _INKERNEL_PE_OK["value"] = True
            return out
        except Exception:
            # Mosaic build without in-kernel sin/cos: use the cached-table path.
            _INKERNEL_PE_OK["value"] = False

    if _INKERNEL_PE_OK["value"]:
        return _forward(x, use_table=False, max_len=max_len)
    return _forward(x, use_table=True, max_len=max_len)


# ---------------------------------------------------------------------------
# Pure-JAX reference mirroring the PyTorch buffer construction
# ---------------------------------------------------------------------------
def _reference(x):
    B, S, D = x.shape
    position = jnp.arange(S, dtype=jnp.float32)[:, None]
    div_term = jnp.exp(jnp.arange(0, D, 2, dtype=jnp.float32)
                       * (-_LOG10000 / D))
    pe = jnp.zeros((S, D), jnp.float32)
    pe = pe.at[:, 0::2].set(jnp.sin(position * div_term))
    pe = pe.at[:, 1::2].set(jnp.cos(position * div_term))
    return (x.astype(jnp.float32) + pe[None, :, :]).astype(x.dtype)


if __name__ == "__main__":
    key = jax.random.PRNGKey(0)
    B, S, D = 2, 8, 32  # batch, seq, d_model
    x = jax.random.normal(key, (B, S, D), dtype=jnp.float32)

    ref = _reference(x)                 # computed before the (aliased) kernel call

    out = positional_encoding(x)
    out = jax.block_until_ready(out)

    assert out.shape == (B, S, D)
    assert out.dtype == x.dtype
    assert jnp.allclose(out, ref, atol=1e-5, rtol=1e-5)

    print("KERNEL_OK")
</pallas_src>

<mosaic_0001>
module attributes {stable_mosaic.version = 11 : i64} {
  func.func @_pe_table_kernel(%arg0: i32, %arg1: i32, %arg2: memref<1x8x32xf32, #tpu.memory_space<vmem>>, %arg3: memref<8x32xf32, #tpu.memory_space<vmem>>, %arg4: memref<1x8x32xf32, #tpu.memory_space<vmem>>) attributes {dimension_semantics = [#tpu.dimension_semantics<parallel>, #tpu.dimension_semantics<arbitrary>], iteration_bounds = array<i64: 1, 2>, scalar_prefetch = 0 : i64, scratch_operands = 0 : i64, tpu.core_type = #tpu.core_type<tc>, window_params = [{transform_indices = @transform_0, window_bounds = array<i64: 1, 8, 32>}, {transform_indices = @transform_1, window_bounds = array<i64: 8, 32>}, {transform_indices = @transform_2, window_bounds = array<i64: 1, 8, 32>}]} {
    %c0 = arith.constant 0 : index
    %c0_0 = arith.constant 0 : index
    %c0_1 = arith.constant 0 : index
    %0 = vector.load %arg2[%c0, %c0_0, %c0_1] : memref<1x8x32xf32, #tpu.memory_space<vmem>>, vector<1x8x32xf32>
    %c0_2 = arith.constant 0 : index
    %c0_3 = arith.constant 0 : index
    %1 = vector.load %arg3[%c0_2, %c0_3] : memref<8x32xf32, #tpu.memory_space<vmem>>, vector<8x32xf32>
    %2 = vector.shape_cast %1 : vector<8x32xf32> to vector<1x8x32xf32>
    %3 = arith.addf %0, %2 : vector<1x8x32xf32>
    %c0_4 = arith.constant 0 : index
    %c0_5 = arith.constant 0 : index
    %c0_6 = arith.constant 0 : index
    %4 = vector.load %arg4[%c0_4, %c0_5, %c0_6] : memref<1x8x32xf32, #tpu.memory_space<vmem>>, vector<1x8x32xf32>
    tpu.vector_store %arg4[%c0_4, %c0_5, %c0_6], %3 {strides = array<i32>} : memref<1x8x32xf32, #tpu.memory_space<vmem>>, vector<1x8x32xf32>,
    return
  }
  func.func @transform_0(%arg0: i32, %arg1: i32) -> (i32, i32, i32) {
    %c0_i32 = arith.constant 0 : i32
    %c0_i32_0 = arith.constant 0 : i32
    return %arg1, %arg0, %c0_i32 : i32, i32, i32
  }
  func.func @transform_1(%arg0: i32, %arg1: i32) -> (i32, i32) {
    %c0_i32 = arith.constant 0 : i32
    %c0_i32_0 = arith.constant 0 : i32
    return %arg0, %c0_i32 : i32, i32
  }
  func.func @transform_2(%arg0: i32, %arg1: i32) -> (i32, i32, i32) {
    %c0_i32 = arith.constant 0 : i32
    %c0_i32_0 = arith.constant 0 : i32
    return %arg1, %arg0, %c0_i32 : i32, i32, i32
  }
}

</mosaic_0001>

<bundles_post_ra>
// kernel: tpu_custom_call.1
= control target key start
LH: loop header
LB: loop body
LE: loop exit
PB: predicated region body
PF: predicated region fallthrough
CT: control target
= control target key end

     0   :  { %7 = vsyncpa [#allocation3], 0  ;;  %s648_s0 = inlined_call_operand.hbm [shape: f32[2,8,32], index: 0, kind: input, shape index: {}, may-alias: {0,2}]   ;;  %s649_s1 = inlined_call_operand.vmem [shape: f32[5000,32], index: 1, kind: input, shape index: {}]   ;;  %s650_s2 = inlined_call_operand.hbm [shape: f32[2,8,32], index: 2, kind: output, shape index: {}, may-alias: {0,2}]  }
   0x1   :  { %9 = vsyncpa [#allocation3 + $0x1], 0 }
   0x2   :  { %10 = vsyncpa [#allocation4], 0 }
   0x3   :  { %12 = vsyncpa [#allocation4 + $0x1], 0  ;;  %s511_s9 = smov 0   ;;  %s513_s10 = smov 0  }
   0x4   :  { %s515_s11 = smov 0   ;;  %s517_s12 = smov 0  }
   0x5   :  { %s519_s13 = smov 0   ;;  %s521_s14 = smov 0  }
   0x6 LB: > { %s308_s15 = sadd.s32 4294967295, %s492_s14   ;;  %s309_s16 = sadd.s32 4294967294, %s492_s14   ;;  %s492_s14 = sphi %s521_s14, %s18_s14   ;;  %s488_s13 = sphi %s519_s13, %s662_s13   ;;  %s484_s12 = sphi %s517_s12, %s661_s12   ;;  %s480_s11 = sphi %s515_s11, %s660_s11   ;;  %s476_s10 = sphi %s513_s10, %s659_s10   ;;  %s472_s9 = sphi %s511_s9, %s658_s9  }
   0x7   : > { %s27_s17 = sadd.s32 1, %s488_s13  ;;  %s39_s18 = sadd.s32 1, %s480_s11 }
   0x8   : > { %p28_p0 = scmp.ge.s32.totalorder %s27_s17, 2  ;;  %p46_p1 = scmp.ne.s32.totalorder %s480_s11, %s476_s10 }
   0x9   : > { %p47_p2 = scmp.eq.s32.totalorder %s492_s14, 0  ;;  %p52_p3 = scmp.ne.s32.totalorder %s476_s10, %s472_s9 }
   0xa   : > { %s664_s17 = smov (%p28_p0, %s27_s17), 0  ;;  %p53_p5 = scmp.eq.s32.totalorder %s308_s15, 0 }
   0xb   : > { %p552_p4 = por %p47_p2, %p46_p1  ;;  %s34_s20 = ssub.s32 %s488_s13, %s664_s17 }
   0xc   : > { %p104_p6 = scmp.eq.s32.totalorder %s308_s15, 1  ;;  %p37_p7 = scmp.eq.s32.totalorder %s34_s20, 0 }
   0xd   : > { %p558_p8 = por %p53_p5, %p52_p3  ;;  %p110_p10 = scmp.eq.s32.totalorder %s309_s16, 1 }
   0xe   : > { %p562_p9 = por %p104_p6, %p46_p1  ;;  %p334_p13 = scmp.lt.s32.totalorder %s492_s14, 2 }
   0xf   : > { %s567_s23 = scalar_select %p37_p7, %s480_s11, %s39_s18  }
  0x10   : > { %p569_p11 = por %p110_p10, %p52_p3  ;;  %s137_s25 = sand.u32 1, %s480_s11  }
  0x11   : > { %s313_s26 = sshll.u32 %s137_s25, 3  ;;  %s314_s27 = sshll.u32 %s488_s13, 7 }
  0x12   : > { %s654_s24 = scalar_select %p569_p11, 1, 0 }
  0x13   : > { %s147_s30 = scalar_lea.hbm %s648_s0, %s314_s27  ;;  %s141_s3 = scalar_lea.vmem [#allocation2], %s313_s26 }
  0x14   : > { %s149_s4 = sshll.u32 %s141_s3, 4  ;;  %p582_p0 = pnand %p334_p13, %p552_p4  ;;  %s150_s4 = int_to_ptr.vmem [resolvable:$true] %s149_s4 }
  0x15   : > { %p315_p1 = scmp.ge.s32.totalorder %s492_s14, 1  ;;  %p154_p2 = scmp.lt.s32.totalorder %s492_s14, 3 }
  0x16   : > { %s138_s6 = scalar_lea.sflag [#allocation3], %s137_s25  ;;  %p386_p3 = pneg %p582_p0 }
  0x17   : > { %s397_s7 = scalar_lea.vmem %s150_s4, 128  ;;  %s494_s8 = smov [#allocation2]  }
  0x18   : > { %p398_p5 = scmp.ne.s32.totalorder %s150_s4, %s397_s7  ;;  %s402_s15 = sshll.u32 %s494_s8, 4  ;;  %s403_s15 = int_to_ptr.vmem [resolvable:$false] %s402_s15 }
  0x19   : > { %s404_s16 = scalar_lea.vmem %s403_s15, 256  ;;  %p405_p10 = scmp.lt.s32.totalorder %s150_s4, %s403_s15 }
  0x1a   : > { %p400_p6 = pnand %p398_p5, %p386_p3  ;;  %p406_p12 = scmp.lt.s32.totalorder %s404_s16, %s397_s7 }
  0x1c   : > { %p401_p7 = pneg %p400_p6  ;;  %p407_p4 = por %p406_p12, %p405_p10 }
  0x1e   : > { %p408_p13 = pnand %p407_p4, %p401_p7 }
  0x20   : > { %411 = shalt.err (!%p408_p13)
}
  0x21   : > { %329 = dma.hbm_to_vmem [thread:$0]  (!%p582_p0), %s147_s30, 128, %s150_s4, %s138_s6  }
  0x22   : > { %p155_p11 = pnand %p315_p1, %p154_p2 }
  0x23   : > { %s597_s18 = sand.u32 (!%p155_p11), 1, %s476_s10  }
  0x24   : > { %158 = sbr.rel (%p155_p11) target bundleno = 66 (0x42), region = 28  ;;  %s316_s19 = sshll.u32 (!%p155_p11), %s597_s18, 3 }
  0x25   : > { %s161_s20 = scalar_lea.sflag (!%p155_p11), [#allocation3], %s597_s18  ;;  %s164_s25 = scalar_lea.vmem (!%p155_p11), [#allocation2], %s316_s19 }
  0x29   : > { %463 = dma.done.wait (%p558_p8), %s161_s20, 128  }
  0x2a   : > { %465 = vsyncadd (%p558_p8), %s161_s20, 4294967168  ;;  %s188_s26 = scalar_lea.vmem [#allocation5], %s316_s19  ;;  %s319_s28 = sshll.u32 %s484_s12, 7  ;;  %v193_v0 = vld [vmem:[%s164_s25] sm:$0xff]  ;;  %vm196_vm0 = vcmask 261120  }
  0x2b   : > { %s213_s27 = sshll.u32 %s188_s26, 4  ;;  %v194_v1 = vld [vmem:[%s649_s1] sm:$0xff]  ;;  %s211_s5 = scalar_lea.hbm %s650_s2, %s319_s28  ;;  %s214_s27 = int_to_ptr.vmem [resolvable:$true] %s213_s27 }
  0x2c   : > { %v195_v2 = vadd.f32 %v194_v1, %v193_v0  ;;  %s199_s21 = scalar_lea.sflag [#allocation4], %s597_s18  ;;  %s412_s6 = scalar_lea.vmem %s214_s27, 128 }
  0x2d   : > { %p413_p8 = scmp.ne.s32.totalorder %s214_s27, %s412_s6  ;;  %s495_s12 = smov [#allocation5]  }
  0x2e   : > { %197 = vst.msk [vmem:[%s188_s26] sm:$0xff] %vm196_vm0, %v195_v2  ;;  %s416_s7 = sshll.u32 %s495_s12, 4  ;;  %s417_s7 = int_to_ptr.vmem [resolvable:$false] %s416_s7 }
  0x2f   : > { %p414_p11 = pnand %p413_p8, %p562_p9  ;;  %s418_s8 = scalar_lea.vmem %s417_s7, 256 }
  0x30   : > { %p419_p0 = scmp.lt.s32.totalorder %s214_s27, %s417_s7  ;;  %p420_p1 = scmp.lt.s32.totalorder %s418_s8, %s412_s6 }
  0x31   : > { %p415_p12 = pneg %p414_p11 }
  0x32   : > { %p421_p2 = por %p420_p1, %p419_p0 }
  0x34   : > { %p422_p3 = pnand %p421_p2, %p415_p12 }
  0x36   : > { %425 = shalt.err (!%p422_p3)
}
  0x37   : > { %s426_s15 = scalar_lea.hbm %s211_s5, 128  ;;  %s430_s19 = scalar_lea.hbm %s650_s2, 256 }
  0x38   : > { %p427_p5 = scmp.ne.s32.totalorder %s211_s5, %s426_s15  ;;  %p431_p10 = scmp.lt.s32.totalorder %s211_s5, %s650_s2 }
  0x39   : > { %p432_p4 = scmp.lt.s32.totalorder %s430_s19, %s426_s15 }
  0x3a   : > { %p428_p6 = pnand %p427_p5, %p562_p9 }
  0x3b   : > { %p433_p13 = por %p432_p4, %p431_p10 }
  0x3c   : > { %p429_p7 = pneg %p428_p6 }
  0x3e   : > { %p434_p8 = pnand %p433_p13, %p429_p7 }
  0x40   : > { %437 = shalt.err (!%p434_p8)
}
  0x41   : > { %324 = dma.vmem_to_hbm [thread:$0]  (%p562_p9), %s214_s27, 128, %s211_s5, %s199_s21  }
  0x42 PF: > { %s225_s26 = sand.u32 1, %s472_s9   ;;  %p656_p11 = scmp.ne.s32.totalorder %s654_s24, 0 }
  0x43   : > { %p657_p12 = scmp.ge.s32.totalorder %s492_s14, 2  ;;  %s226_s28 = scalar_lea.sflag [#allocation4], %s225_s26 }
  0x45   : > { %p331_p0 = pnand %p657_p12, %p656_p11 }
  0x47   : > { %p332_p1 = pneg %p331_p0 }
  0x49   : > { %467 = dma.done.wait (%p332_p1), %s226_s28, 128  }
  0x4a   : > { %469 = vsyncadd (%p332_p1), %s226_s28, 4294967168  ;;  %s18_s14 = sadd.s32 1, %s492_s14   ;;  %s658_s9 = smov %s476_s10 }
  0x4b   : > { %p15_p2 = scmp.ge.s32.totalorder %s18_s14, 4   ;;  %s659_s10 = smov %s480_s11 }
  0x4c   : > { %s660_s11 = smov %s567_s23  ;;  %s661_s12 = smov %s488_s13 }
  0x4d   : > { %s662_s13 = smov %s664_s17  ;;  %17 = sbr.rel (!%p15_p2) target bundleno = 6 (0x6), region = 76 }
  0x52   :  { %231 = vsyncpa [#allocation3], 1 }
  0x53   :  { %233 = vsyncpa [#allocation3 + $0x1], 1 }
  0x54   :  { %234 = vsyncpa [#allocation4], 1 }
  0x55   :  { %236 = vsyncpa [#allocation4 + $0x1], 1 }

</bundles_post_ra>
